<compile_context>
chip_gen: v5e
topology: v5e:2x2
jax: 0.10.0
libtpu: 0.0.40
codegen_flags: <defaults>
</compile_context>

<pallas_src>
import numpy as np
import jax
import jax.numpy as jnp
from jax.experimental import pallas as pl
from jax.experimental.pallas import tpu as pltpu

V = 15                 # number of joints
C_IN = 3               # xyz per joint
K_PART = 2             # distance partitions: hop-0 (self) + hop-1 (neighbors)
K_DIM = V * C_IN       # 45 contraction dim


def build_adjacency_distance():
    """15-joint skeleton, ST-GCN 'distance' partitioning (max_hop=1)."""
    # head, neck, torso, l_sho, l_elb, l_hand, r_sho, r_elb, r_hand,
    # l_hip, l_knee, l_foot, r_hip, r_knee, r_foot
    edges = [(0, 1), (1, 2), (1, 3), (3, 4), (4, 5), (1, 6), (6, 7), (7, 8),
             (2, 9), (9, 10), (10, 11), (2, 12), (12, 13), (13, 14)]
    adj = np.zeros((V, V), np.float32)
    for i, j in edges:
        adj[i, j] = 1.0
        adj[j, i] = 1.0
    hop0 = np.eye(V, dtype=np.float32)
    a_full = adj + hop0
    # normalize_digraph: A @ D^{-1}
    dl = a_full.sum(axis=0)
    dn = np.diag(1.0 / np.maximum(dl, 1e-6)).astype(np.float32)
    ad = a_full @ dn
    a0 = np.where(hop0 > 0, ad, 0.0)   # hop 0 partition
    a1 = np.where(adj > 0, ad, 0.0)    # hop 1 partition
    return np.stack([a0, a1]).astype(np.float32)  # [K, V, V]


# ----------------------------- Pallas kernel --------------------------------
def gcn_matmul_kernel(x_ref, w_ref, b_ref, o_ref):
    # x_ref: [tm, 45] f32   w_ref: [45, n_out] bf16   b_ref: [1, n_out] f32
    # o_ref: [tm, n_out] bf16
    x = x_ref[...].astype(w_ref.dtype)                 # cast in-kernel (1 HBM read)
    acc = jnp.dot(x, w_ref[...], preferred_element_type=jnp.float32)
    o_ref[...] = jnp.maximum(acc + b_ref[...], 0.0).astype(o_ref.dtype)


def _round_up(x, m):
    return ((x + m - 1) // m) * m


def key_encoder_forward(upper_l, h0, c0, batch_size, length_size,
                        Bmat, bias, hidden_dim, tm=4096,
                        vmem_budget_bytes=12 * 1024 * 1024):
    """upper_l: [B, T, 15, 3] -> g_vec: [B*T, 15, hidden_dim].
    h0 / c0 are unused by the reference forward (kept for signature parity)."""
    del h0, c0
    nt = batch_size * length_size
    n_out = V * hidden_dim
    out_dtype = Bmat.dtype

    # Free (contiguous) reshape; no host-side pad / scatter / cast pre-pass.
    x_flat = upper_l.reshape(nt, K_DIM)
    in_itemsize = np.dtype(x_flat.dtype).itemsize
    w_itemsize = np.dtype(Bmat.dtype).itemsize
    out_itemsize = np.dtype(out_dtype).itemsize

    # VMEM accounting: double-buffered input + output tiles, f32 matmul
    # accumulator, plus the (small) double-buffered weight and bias.
    per_row_bytes = (2 * K_DIM * in_itemsize       # input tile, double-buffered
                     + 2 * n_out * out_itemsize    # output tile, double-buffered
                     + n_out * 4)                  # f32 accumulator before ReLU/cast
    fixed_bytes = 2 * K_DIM * n_out * w_itemsize + 2 * n_out * 4
    tm_cap = max(8, ((vmem_budget_bytes - fixed_bytes) // per_row_bytes) // 8 * 8)

    tm = max(8, (int(tm) // 8) * 8)                # user tm -> multiple of 8
    tm = min(tm, tm_cap)
    if nt >= 1024:
        # Guarantee >= 2 grid programs so the 'parallel' axis can shard across
        # both TensorCores on v7x (skipped for tiny, latency-bound nt).
        tm = min(tm, _round_up(-(-nt // 2), 8))
    tm = min(tm, _round_up(nt, 8))                 # single block for tiny nt

    cost = pl.CostEstimate(
        flops=2 * nt * K_DIM * n_out,
        transcendentals=0,
        bytes_accessed=(nt * K_DIM * in_itemsize       # read x once
                        + K_DIM * n_out * w_itemsize   # read weights
                        + n_out * 4                    # read bias
                        + nt * n_out * out_itemsize))  # write output once

    out_flat = pl.pallas_call(
        gcn_matmul_kernel,
        out_shape=jax.ShapeDtypeStruct((nt, n_out), out_dtype),
        grid_spec=pl.GridSpec(
            grid=(pl.cdiv(nt, tm),),
            in_specs=[
                pl.BlockSpec((tm, K_DIM), lambda i: (i, 0)),
                pl.BlockSpec((K_DIM, n_out), lambda i: (0, 0)),
                pl.BlockSpec((1, n_out), lambda i: (0, 0)),
            ],
            out_specs=pl.BlockSpec((tm, n_out), lambda i: (i, 0)),
        ),
        compiler_params=pltpu.CompilerParams(
            dimension_semantics=("parallel",)),
        cost_estimate=cost,
    )(x_flat, Bmat, bias)

    # g_vec = k_vec.view(batch_size * length_size, 15, -1); n_out == 15*H so
    # this is a free view, no post-kernel slice / extra HBM pass.
    return out_flat.reshape(nt, V, hidden_dim)


def make_params(hidden_dim, key, dtype=jnp.bfloat16):
    """Deterministic synthetic GCN weights collapsed into one linear map.

    Bmat[(w_joint, c_in), (v_joint, c_out)] = sum_k A_k[v, w] * W_k[c_out, c_in]
    Only the 15 real joints' output columns are materialized, so the kernel
    writes the final layout directly.  Bias is a separate [1, 15*H] operand."""
    kw, kb = jax.random.split(key)
    w = jax.random.normal(kw, (K_PART, hidden_dim, C_IN), jnp.float32) * 0.1
    b = jax.random.normal(kb, (hidden_dim,), jnp.float32) * 0.01
    A = jnp.asarray(build_adjacency_distance())                      # [K,V,V]
    Bmat = jnp.einsum('kvw,koc->wcvo', A, w).reshape(
        V * C_IN, V * hidden_dim)                                    # [45, 15H]
    bias = jnp.tile(b, (V,))[None, :].astype(jnp.float32)            # [1, 15H]
    return Bmat.astype(dtype), bias, A, w, b


def reference_forward(upper_l, A, w, b, batch_size, length_size, hidden_dim):
    """Pure-JAX f32 reference of the same graph conv for correctness check."""
    x = upper_l.reshape(batch_size * length_size, V, C_IN)          # [NT,V,C]
    y = jnp.einsum('kvw,nwc,koc->nvo', A, x, w) + b[None, None, :]  # [NT,V,H]
    return jnp.maximum(y, 0.0)


if __name__ == "__main__":
    batch_size, length_size, hidden_dim = 2, 8, 32

    key = jax.random.PRNGKey(0)
    k_in, k_h, k_c, k_par = jax.random.split(key, 4)

    upper_l = jax.random.normal(
        k_in, (batch_size, length_size, V, C_IN), jnp.float32)
    # h0 / c0 exist in the PyTorch signature but are unused by forward().
    h0 = jax.random.normal(k_h, (1, batch_size, hidden_dim), jnp.float32)
    c0 = jax.random.normal(k_c, (1, batch_size, hidden_dim), jnp.float32)

    Bmat, bias, A, w, b = make_params(hidden_dim, k_par, dtype=jnp.bfloat16)

    g_vec = key_encoder_forward(upper_l, h0, c0, batch_size, length_size,
                                Bmat, bias, hidden_dim)
    g_vec = jax.block_until_ready(g_vec)

    ref = reference_forward(upper_l, A, w, b, batch_size, length_size,
                            hidden_dim)
    assert g_vec.shape == (batch_size * length_size, V, hidden_dim)
    np.testing.assert_allclose(np.asarray(g_vec, dtype=np.float32),
                               np.asarray(ref), rtol=2e-2, atol=2e-2)
    print("KERNEL_OK")
</pallas_src>

<mosaic_0001>
module attributes {stable_mosaic.version = 11 : i64} {
  func.func @gcn_matmul_kernel(%arg0: i32, %arg1: memref<16x45xf32, #tpu.memory_space<vmem>>, %arg2: memref<45x480xbf16, #tpu.memory_space<vmem>>, %arg3: memref<1x480xf32, #tpu.memory_space<vmem>>, %arg4: memref<16x480xbf16, #tpu.memory_space<vmem>>) attributes {dimension_semantics = [#tpu.dimension_semantics<parallel>], iteration_bounds = array<i64: 1>, scalar_prefetch = 0 : i64, scratch_operands = 0 : i64, tpu.core_type = #tpu.core_type<tc>, window_params = [{transform_indices = @transform_0, window_bounds = array<i64: 16, 45>}, {pipeline_mode = #tpu.pipeline_mode<synchronous>, transform_indices = @transform_1, window_bounds = array<i64: 45, 480>}, {pipeline_mode = #tpu.pipeline_mode<synchronous>, transform_indices = @transform_2, window_bounds = array<i64: 1, 480>}, {transform_indices = @transform_3, window_bounds = array<i64: 16, 480>}]} {
    %c0 = arith.constant 0 : index
    %c0_0 = arith.constant 0 : index
    %0 = vector.load %arg1[%c0, %c0_0] : memref<16x45xf32, #tpu.memory_space<vmem>>, vector<16x45xf32>
    %1 = arith.truncf %0 : vector<16x45xf32> to vector<16x45xbf16>
    %c0_1 = arith.constant 0 : index
    %c0_2 = arith.constant 0 : index
    %2 = vector.load %arg2[%c0_1, %c0_2] : memref<45x480xbf16, #tpu.memory_space<vmem>>, vector<45x480xbf16>
    %cst = arith.constant dense<0.000000e+00> : vector<16x480xf32>
    %3 = tpu.matmul %1, %2, %cst {dimension_numbers = #tpu.dot_dimension_numbers<[1], [0], [0], [1], [0, 0, 1, 1], [], []>} : vector<16x45xbf16>, vector<45x480xbf16>, vector<16x480xf32> -> vector<16x480xf32>
    %c0_3 = arith.constant 0 : index
    %c0_4 = arith.constant 0 : index
    %4 = vector.load %arg3[%c0_3, %c0_4] : memref<1x480xf32, #tpu.memory_space<vmem>>, vector<1x480xf32>
    %5 = vector.broadcast %4 : vector<1x480xf32> to vector<16x480xf32>
    %6 = arith.addf %3, %5 : vector<16x480xf32>
    %cst_5 = arith.constant 0.000000e+00 : f32
    %7 = vector.broadcast %cst_5 : f32 to vector<16x480xf32>
    %8 = arith.maximumf %6, %7 : vector<16x480xf32>
    %9 = arith.truncf %8 : vector<16x480xf32> to vector<16x480xbf16>
    %c0_6 = arith.constant 0 : index
    %c0_7 = arith.constant 0 : index
    %10 = vector.load %arg4[%c0_6, %c0_7] : memref<16x480xbf16, #tpu.memory_space<vmem>>, vector<16x480xbf16>
    tpu.vector_store %arg4[%c0_6, %c0_7], %9 {strides = array<i32>} : memref<16x480xbf16, #tpu.memory_space<vmem>>, vector<16x480xbf16>,
    return
  }
  func.func @transform_0(%arg0: i32) -> (i32, i32) {
    %c0_i32 = arith.constant 0 : i32
    %c0_i32_0 = arith.constant 0 : i32
    return %arg0, %c0_i32 : i32, i32
  }
  func.func @transform_1(%arg0: i32) -> (i32, i32) {
    %c0_i32 = arith.constant 0 : i32
    %c0_i32_0 = arith.constant 0 : i32
    %c0_i32_1 = arith.constant 0 : i32
    return %c0_i32, %c0_i32_0 : i32, i32
  }
  func.func @transform_2(%arg0: i32) -> (i32, i32) {
    %c0_i32 = arith.constant 0 : i32
    %c0_i32_0 = arith.constant 0 : i32
    %c0_i32_1 = arith.constant 0 : i32
    return %c0_i32, %c0_i32_0 : i32, i32
  }
  func.func @transform_3(%arg0: i32) -> (i32, i32) {
    %c0_i32 = arith.constant 0 : i32
    %c0_i32_0 = arith.constant 0 : i32
    return %arg0, %c0_i32 : i32, i32
  }
}

</mosaic_0001>

<bundles_post_ra>
// kernel: tpu_custom_call.1
= control target key start
LH: loop header
LB: loop body
LE: loop exit
PB: predicated region body
PF: predicated region fallthrough
CT: control target
= control target key end

     0   :  { %8 = vsyncpa [#allocation3], 0  ;;  %s487_s0 = inlined_call_operand.hbm [shape: f32[16,45], index: 0, kind: input, shape index: {}]   ;;  %s488_s1 = inlined_call_operand.hbm [shape: bf16[45,480], index: 1, kind: input, shape index: {}]   ;;  %s489_s2 = inlined_call_operand.hbm [shape: f32[1,480], index: 2, kind: input, shape index: {}]   ;;  %s490_s3 = inlined_call_operand.hbm [shape: bf16[16,480], index: 3, kind: output, shape index: {}]  }
   0x1   :  { %9 = vsyncpa [#allocation6], 0  ;;  %s28_s14 = sshll.u32 %s488_s1, 4  ;;  %s29_s14 = int_to_ptr.hbm [resolvable:$true] %s28_s14 }
   0x2   :  { %10 = vsyncpa [#allocation4], 0  ;;  %s432_s15 = smov [#allocation5]   ;;  %s15_s19 = sshll.u32 %s487_s0, 4  ;;  %s16_s19 = int_to_ptr.hbm [resolvable:$true] %s15_s19 }
   0x3   :  { %s30_s16 = sshll.u32 %s432_s15, 4  ;;  %s433_s20 = smov 256   ;;  %s31_s16 = int_to_ptr.vmem [resolvable:$true] %s30_s16 }
   0x4   :  { %s434_s21 = smov 16   ;;  %s435_s22 = smov [#allocation2]  }
   0x5   :  { %36 = dma.hbm_to_vmem [thread:$0]  %s29_s14, 1536, %s31_s16, [#allocation6], %s433_s20, %s433_s20, %s434_s21  }
   0x6   :  { %s17_s23 = sshll.u32 %s435_s22, 4  ;;  %s436_s1 = smov 128   ;;  %s18_s23 = int_to_ptr.vmem [resolvable:$true] %s17_s23 }
   0x7   :  { %s437_s24 = smov 8   ;;  %s42_s27 = sshll.u32 %s489_s2, 4  ;;  %s43_s27 = int_to_ptr.hbm [resolvable:$true] %s42_s27 }
   0x8   :  { %23 = dma.hbm_to_vmem [thread:$0]  %s16_s19, 256, %s18_s23, [#allocation3], %s436_s1, %s436_s1, %s437_s24  }
   0x9   :  { %s438_s28 = smov [#allocation7]  }
   0xa   :  { %s44_s0 = sshll.u32 %s438_s28, 4  ;;  %s45_s0 = int_to_ptr.vmem [resolvable:$true] %s44_s0 }
   0xb   :  { %47 = dma.hbm_to_vmem [thread:$0]  %s43_s27, 64, %s45_s0, [#allocation6]  }
   0xc   :  { %426 = dma.done.wait [#allocation3], 256  }
   0xd   :  { %427 = vsyncadd [#allocation3], 4294967040 }
   0xe   :  { %428 = dma.done.wait [#allocation6], 1600  }
   0xf   :  { %429 = vsyncadd [#allocation6], 4294965696  ;;  %vm146_vm0 = vcmask 1045504   ;;  %vm147_vm1 = vcmask 1046528   ;;  %v439_v0 = vmov 65535   ;;  %v61_v40 = vld [vmem:[#allocation2] sm:$0xff] }
  0x10   :  { %v148_v1 = vsel %vm146_vm0, 4294967295, %v439_v0  ;;  %v291_v3 = vld [vmem:[#allocation5 + $0x40] sm:$0xf]  ;;  %v319_v4 = vld [vmem:[#allocation5 + $0x4c] sm:$0x70]  ;;  %v62_v41 = vld [vmem:[#allocation2 + $0x8] sm:$0xff] }
  0x11   :  { %v149_v2 = vsel %vm147_vm1, %v148_v1, 0  ;;  %v317_v5 = vld [vmem:[#allocation5 + $0x44] sm:$0xf]  ;;  %v292_v6 = vor.u32 %v319_v4, %v291_v3  ;;  %v293_v7 = vld [vmem:[#allocation5 + $0x50] sm:$0x70]  ;;  %v63_v45 = vpack.c.bf16 %v62_v41, %v61_v40  ;;  %vm142_vm2 = vcmask 367616  }
  0x12   :  { %v299_v8 = vld [vmem:[#allocation5 + $0x48] sm:$0xf]  ;;  %v320_v9 = vld [vmem:[#allocation5 + $0x54] sm:$0x70]  ;;  %v296_v10 = vor.u32 %v317_v5, %v293_v7  ;;  %v318_v12 = vld [vmem:[#allocation5 + $0x4c] sm:$0xf] }
  0x13   :  { %v300_v11 = vor.u32 %v320_v9, %v299_v8  ;;  %v301_v13 = vld [vmem:[#allocation5 + $0x58] sm:$0x70]  ;;  %v275_v14 = vld [vmem:[#allocation5 + $0x20] sm:$0xf]  ;;  %v151_v15 = vand.u32 %v292_v6, %v149_v2  ;;  %v315_v17 = vld [vmem:[#allocation5 + $0x2c] sm:$0xf0] }
  0x14   :  { %v304_v16 = vor.u32 %v318_v12, %v301_v13  ;;  %v313_v18 = vld [vmem:[#allocation5 + $0x24] sm:$0xf]  ;;  %v277_v19 = vld [vmem:[#allocation5 + $0x30] sm:$0xf0]  ;;  %v154_v20 = vand.u32 %v296_v10, %v149_v2  ;;  %v283_v22 = vld [vmem:[#allocation5 + $0x28] sm:$0xf]  ;;  %v276_v26 = vor.u32 %v315_v17, %v275_v14 }
  0x15   :  { %v157_v21 = vand.u32 %v300_v11, %v149_v2  ;;  %v316_v23 = vld [vmem:[#allocation5 + $0x34] sm:$0xf0]  ;;  %v314_v24 = vld [vmem:[#allocation5 + $0x2c] sm:$0xf]  ;;  %167 = vmatpush.bf16.msra.mxu0 %v151_v15  ;;  %v285_v27 = vld [vmem:[#allocation5 + $0x38] sm:$0xf0]  ;;  %v280_v28 = vor.u32 %v313_v18, %v277_v19 }
  0x16   :  { %v160_v25 = vand.u32 %v304_v16, %v149_v2  ;;  %181 = vmatpush.bf16.msra.mxu1 %v154_v20  ;;  %v284_v29 = vor.u32 %v316_v23, %v283_v22  ;;  %v259_v30 = vld [vmem:[#allocation5] sm:$0xf]  ;;  %v311_v31 = vld [vmem:[#allocation5 + $0xc] sm:$0xf0]  ;;  %v309_v32 = vld [vmem:[#allocation5 + $0x4] sm:$0xf]  ;;  %v288_v33 = vor.u32 %v314_v24, %v285_v27 }
  0x17   :  { %195 = vmatpush.bf16.msra.mxu2 %v157_v21  ;;  %v261_v34 = vld [vmem:[#allocation5 + $0x10] sm:$0xf0]  ;;  %v267_v35 = vld [vmem:[#allocation5 + $0x8] sm:$0xf]  ;;  %v312_v36 = vld [vmem:[#allocation5 + $0x14] sm:$0xf0]  ;;  %v260_v39 = vor.u32 %v311_v31, %v259_v30 }
  0x18   :  { %209 = vmatpush.bf16.msra.mxu3 %v160_v25  ;;  %v310_v37 = vld [vmem:[#allocation5 + $0xc] sm:$0xf]  ;;  %v269_v38 = vld [vmem:[#allocation5 + $0x18] sm:$0xf0]  ;;  %v264_v42 = vor.u32 %v309_v32, %v261_v34  ;;  %v268_v43 = vor.u32 %v312_v36, %v267_v35  ;;  %v76_v46 = vld [vmem:[#allocation7] sm:$0xf] }
  0x19   :  { %168 = vmatpush.bf16.msra.mxu0 %v276_v26  ;;  %v272_v44 = vor.u32 %v310_v37, %v269_v38  ;;  %v78_v47 = vperm.slane %v76_v46, 0  ;;  %v79_v48 = vperm.slane %v76_v46, 1  ;;  %v80_v55 = vperm.slane %v76_v46, 2  ;;  %s440_s2 = smov [#allocation8]   ;;  %s243_s5 = sshll.u32 %s490_s3, 4  ;;  %s244_s5 = int_to_ptr.hbm [resolvable:$true] %s243_s5 }
  0x1a   :  { %182 = vmatpush.bf16.msra.mxu1 %v280_v28  ;;  %v81_v56 = vperm.slane %v76_v46, 3  ;;  %vm231_vm3 = vcmask 1043456   ;;  %vm232_vm4 = vcmask 785412   ;;  %s241_s29 = sshll.u32 %s440_s2, 4  ;;  %s242_s29 = int_to_ptr.vmem [resolvable:$true] %s241_s29 }
  0x1b   :  { %196 = vmatpush.bf16.msra.mxu2 %v284_v29  ;;  %vm473_vm5 = vmor %vm232_vm4, %vm231_vm3 }
  0x1c   :  { %210 = vmatpush.bf16.msra.mxu3 %v288_v33 }
  0x1d   :  { %169 = vmatpush.bf16.msra.mxu0 %v260_v39 }
  0x1e   :  { %183 = vmatpush.bf16.msra.mxu1 %v264_v42 }
  0x1f   :  { %197 = vmatpush.bf16.msra.mxu2 %v268_v43 }
  0x20   :  { %211 = vmatpush.bf16.msra.mxu3 %v272_v44  ;;  %305 = vmatmul.msk.bf16.vlgmr.msra.gmra.mxu0 %vm142_vm2, %v63_v45 }
  0x21   :  { %306 = vmatmul.msk.bf16.vlgmr.msra.gmra.mxu1 %vm142_vm2, %v63_v45 }
  0x22   :  { %307 = vmatmul.msk.bf16.vlgmr.msra.gmra.mxu2 %vm142_vm2, %v63_v45 }
  0x23   :  { %308 = vmatmul.msk.bf16.vlgmr.msra.gmra.mxu3 %vm142_vm2, %v63_v45 }
  0x9d   :  { %v171_v49 = vpop.f32.mrf.mxu0 }
  0x9e   :  { %v172_v50 = vadd.f32 %v171_v49, %v78_v47  ;;  %v185_v51 = vpop.f32.mrf.mxu1 }
  0x9f   :  { %v186_v52 = vadd.f32 %v185_v51, %v79_v48 }
  0xa0   :  { %v218_v53 = vmax.f32 %v172_v50, 0.0 }
  0xa1   :  { %v219_v54 = vmax.f32 %v186_v52, 0.0 }
  0xa3   :  { %v226_v57 = vpack.c.bf16 %v219_v54, %v218_v53 }
  0xa5   :  { %v199_v58 = vpop.f32.mrf.mxu2  ;;  %230 = vst [vmem:[#allocation8] sm:$0xff] %v226_v57  ;;  %v173_v61 = vpop.f32.mrf.mxu0 }
  0xa6   :  { %v200_v59 = vadd.f32 %v199_v58, %v80_v55  ;;  %v213_v60 = vpop.f32.mrf.mxu3  ;;  %v174_v63 = vadd.f32 %v173_v61, %v78_v47  ;;  %v187_v0 = vpop.f32.mrf.mxu1 }
  0xa7   :  { %v214_v62 = vadd.f32 %v213_v60, %v81_v56  ;;  %v188_v2 = vadd.f32 %v187_v0, %v79_v48 }
  0xa8   :  { %v220_v1 = vmax.f32 %v200_v59, 0.0  ;;  %v222_v4 = vmax.f32 %v174_v63, 0.0 }
  0xa9   :  { %v221_v3 = vmax.f32 %v214_v62, 0.0  ;;  %v223_v6 = vmax.f32 %v188_v2, 0.0 }
  0xab   :  { %v227_v7 = vpack.c.bf16 %v221_v3, %v220_v1  ;;  %v228_v8 = vpack.c.bf16 %v223_v6, %v222_v4 }
  0xad   :  { %234 = vst.msk [vmem:[#allocation8 + $0x8] sm:$0xff] %vm473_vm5, %v227_v7  ;;  %v201_v9 = vpop.f32.mrf.mxu2 }
  0xae   :  { %235 = vst [vmem:[#allocation8 + $0x10] sm:$0xff] %v228_v8  ;;  %v202_v10 = vadd.f32 %v201_v9, %v80_v55  ;;  %v215_v11 = vpop.f32.mrf.mxu3 }
  0xaf   :  { %v216_v12 = vadd.f32 %v215_v11, %v81_v56 }
  0xb0   :  { %v224_v13 = vmax.f32 %v202_v10, 0.0 }
  0xb1   :  { %v225_v14 = vmax.f32 %v216_v12, 0.0 }
  0xb3   :  { %v229_v15 = vpack.c.bf16 %v225_v14, %v224_v13 }
  0xb5   :  { %236 = vst.msk [vmem:[#allocation8 + $0x18] sm:$0xff] %vm473_vm5, %v229_v15 }
  0xb6   :  { %249 = dma.vmem_to_hbm [thread:$0]  %s242_s29, 512, %s244_s5, [#allocation4], %s433_s20, %s433_s20, %s434_s21  }
  0xb7   :  { %430 = dma.done.wait [#allocation4], 512  }
  0xb8   :  { %431 = vsyncadd [#allocation4], 4294966784 }
  0xb9   :  { %254 = vsyncpa [#allocation3], 1 }
  0xba   :  { %255 = vsyncpa [#allocation6], 1 }
  0xbb   :  { %256 = vsyncpa [#allocation4], 1 }

</bundles_post_ra>
